<compile_context>
chip_gen: v6e
topology: v6e:2x2x1
jax: 0.10.0
libtpu: 0.0.40
codegen_flags: <defaults>
</compile_context>

<pallas_src>
import functools

import jax
import jax.numpy as jnp
from jax.experimental import pallas as pl
from jax.experimental.pallas import tpu as pltpu


def _round_up(x, m):
    return (x + m - 1) // m * m


# --------------------------------------------------------------------------- #
# Kernel
# --------------------------------------------------------------------------- #
def rnn_agent_kernel(x_ref, h_ref, wgx_ref, wgh_ref, bg_ref, wo_ref, bo_ref,
                     out_ref, *, hidden_dim):
    H = hidden_dim
    f32 = jnp.float32

    x = x_ref[...].astype(f32)          # (TB, I)
    h_in = h_ref[...].astype(f32)       # (TB, H)

    # All four gate pre-activations from two accumulating MXU passes (no
    # [x | h] lane concat).  Columns: [r_pre | z_pre | i_n | h_n]  (4H = 128).
    pre = (jnp.dot(x, wgx_ref[...], preferred_element_type=f32)
           + jnp.dot(h_in, wgh_ref[...], preferred_element_type=f32)
           + bg_ref[...])

    # Single EUP push for both sigmoid gates (contiguous 2H lanes), then slice.
    rz = jax.nn.sigmoid(pre[:, :2 * H])
    r, z = rz[:, :H], rz[:, H:]
    n = jnp.tanh(pre[:, 2 * H:3 * H] + r * pre[:, 3 * H:4 * H])
    h = (1.0 - z) * n + z * h_in                                    # (TB, H)

    # fc2 -> fc3 folded into one matmul whose output IS the lane-dense packed
    # slab [0 | q | 0] (q in columns H:H+O); no output concat, one unmasked
    # 128-wide store.  The h columns are then overwritten with the exact h
    # (cheap lane-aligned masked store) so the recurrent state does not depend
    # on MXU f32-decomposition rounding.
    out_ref[...] = (jnp.dot(h, wo_ref[...], preferred_element_type=f32)
                    + bo_ref[...]).astype(out_ref.dtype)
    out_ref[:, :H] = h.astype(out_ref.dtype)


# --------------------------------------------------------------------------- #
# Offline parameter folding (plain JAX, done once)
# --------------------------------------------------------------------------- #
def pack_params(raw, input_shape, hidden_dim, output_shape):
    I, H, O = input_shape, hidden_dim, output_shape
    mm = functools.partial(jnp.matmul, precision=jax.lax.Precision.HIGHEST)

    w1, b1 = raw["w1"], raw["b1"]                       # (I,H), (1,H)
    w_ih, b_ih = raw["w_ih"], raw["b_ih"]               # (H,3H), (1,3H)  [r,z,n]
    w_hh, b_hh = raw["w_hh"], raw["b_hh"]               # (H,3H), (1,3H)  [r,z,n]
    w2, b2, w3, b3 = raw["w2"], raw["b2"], raw["w3"], raw["b3"]

    w_ir, w_iz, w_in = w_ih[:, :H], w_ih[:, H:2 * H], w_ih[:, 2 * H:]
    b_ir, b_iz, b_in = b_ih[:, :H], b_ih[:, H:2 * H], b_ih[:, 2 * H:]
    w_hr, w_hz, w_hn = w_hh[:, :H], w_hh[:, H:2 * H], w_hh[:, 2 * H:]
    b_hr, b_hz, b_hn = b_hh[:, :H], b_hh[:, H:2 * H], b_hh[:, 2 * H:]

    # x-side gate weights (fc1 folded in):  [r | z | n | 0]  -> (I, 4H).
    # The small zero block keeps both sides at a full 4H=128 lane width so the
    # two partial products add with no sub-vreg slicing (MXU does the add).
    w_gx = jnp.concatenate(
        [mm(w1, w_ir), mm(w1, w_iz), mm(w1, w_in),
         jnp.zeros((I, H), jnp.float32)], axis=1)
    # h-side gate weights:  [r | z | 0 | n]  -> (H, 4H).
    w_gh = jnp.concatenate(
        [w_hr, w_hz, jnp.zeros((H, H), jnp.float32), w_hn], axis=1)
    b_g = jnp.concatenate(
        [mm(b1, w_ir) + b_ir + b_hr,      # r_pre bias
         mm(b1, w_iz) + b_iz + b_hz,      # z_pre bias
         mm(b1, w_in) + b_in,             # i_n bias
         b_hn],                           # h_n bias
        axis=1)                                                   # (1, 4H)

    # fc2 -> fc3 folded; columns laid out so the kernel's single output matmul
    # produces the packed [ (zeros->h) | q | 0 ] slab of width round_up(H+O,128).
    w23 = mm(w2, w3)                                              # (H, O)
    b23 = mm(b2, w3) + b3                                         # (1, O)
    W = _round_up(H + O, 128)
    w_out = jnp.zeros((H, W), jnp.float32).at[:, H:H + O].set(w23)
    b_out = jnp.zeros((1, W), jnp.float32).at[:, H:H + O].set(b23)

    return {"w_gx": w_gx, "w_gh": w_gh, "b_g": b_g,
            "w_out": w_out, "b_out": b_out}


# --------------------------------------------------------------------------- #
# Wrapper
# --------------------------------------------------------------------------- #
def _pick_batch_tile(batch, batch_tile):
    """Batch tile: multiple of 8, <= batch_tile, preferring (a) an exact divisor
    of the batch (no jnp.pad copy of inputs/h) and (b) >= 2 grid steps when the
    batch is splittable so v7x's two TensorCores both get work."""
    cap = max(8, min(batch_tile, _round_up(batch, 8)))
    cap -= cap % 8
    if batch % 8 == 0:
        for tb in range(cap, 7, -8):
            if batch % tb == 0:
                if tb == batch and batch >= 16 and (batch // 2) % 8 == 0:
                    return batch // 2     # split one full tile across 2 TCs
                return tb
    return cap


def rnn_agent_forward(inputs, hidden_state, packed, hidden_dim, output_shape,
                      *, batch_tile=512, out_dtype=None):
    """inputs: (B, input_shape); hidden_state: reshapeable to (-1, H).

    Activations may be bf16 for ~2x less HBM traffic in this memory-bound
    kernel (math stays f32 in-kernel); pass f32 for exact-parity mode.
    """
    H, O = hidden_dim, output_shape
    B, I = inputs.shape
    h_in = hidden_state.reshape(-1, H)                 # glue: plain JAX reshape
    out_dtype = out_dtype or inputs.dtype

    w_gx, w_gh, b_g = packed["w_gx"], packed["w_gh"], packed["b_g"]
    w_out, b_out = packed["w_out"], packed["b_out"]
    G = w_gx.shape[1]              # 4H
    W = w_out.shape[1]             # packed output width (multiple of 128)

    TB = _pick_batch_tile(B, batch_tile)
    B_pad = _round_up(B, TB)
    if B_pad != B:
        # TODO(synk): for ragged batches, pass B via scalar prefetch and mask
        # the last tile in-kernel instead of materializing padded copies here.
        inputs = jnp.pad(inputs, ((0, B_pad - B), (0, 0)))
        h_in = jnp.pad(h_in, ((0, B_pad - B), (0, 0)))

    kernel = functools.partial(rnn_agent_kernel, hidden_dim=H)

    packed_out = pl.pallas_call(
        kernel,
        out_shape=jax.ShapeDtypeStruct((B_pad, W), out_dtype),
        grid=(B_pad // TB,),
        in_specs=[
            pl.BlockSpec((TB, I), lambda i: (i, 0)),        # inputs (batch-tiled)
            pl.BlockSpec((TB, H), lambda i: (i, 0)),        # hidden (batch-tiled)
            pl.BlockSpec((I, G), lambda i: (0, 0)),         # x-side gate weights
            pl.BlockSpec((H, G), lambda i: (0, 0)),         # h-side gate weights
            pl.BlockSpec((1, G), lambda i: (0, 0)),         # gate bias
            pl.BlockSpec((H, W), lambda i: (0, 0)),         # fused fc23 weights
            pl.BlockSpec((1, W), lambda i: (0, 0)),         # fused fc23 bias
        ],
        out_specs=pl.BlockSpec((TB, W), lambda i: (i, 0)),
        compiler_params=pltpu.CompilerParams(
            dimension_semantics=("parallel",),
            vmem_limit_bytes=32 * 1024 * 1024,              # safe on v5e/v6e/v7x
        ),
    )(inputs, h_in, w_gx, w_gh, b_g, w_out, b_out)

    h = packed_out[:B, :H]
    q = packed_out[:B, H:H + O]
    return q, h


# --------------------------------------------------------------------------- #
# Synthetic parameters + pure-JAX reference (mirrors the PyTorch forward)
# --------------------------------------------------------------------------- #
def make_params(key, input_shape, hidden_dim, output_shape):
    """Raw module parameters in (in, out) layout; biases as (1, n)."""
    ks = jax.random.split(key, 10)
    I, H, O = input_shape, hidden_dim, output_shape

    def w(k, a, b):
        return jax.random.normal(k, (a, b), jnp.float32) * 0.1

    def bias(k, n):
        return jax.random.normal(k, (1, n), jnp.float32) * 0.1

    return {
        "w1": w(ks[0], I, H), "b1": bias(ks[1], H),
        "w_ih": w(ks[2], H, 3 * H), "b_ih": bias(ks[3], 3 * H),
        "w_hh": w(ks[4], H, 3 * H), "b_hh": bias(ks[5], 3 * H),
        "w2": w(ks[6], H, H), "b2": bias(ks[7], H),
        "w3": w(ks[8], H, O), "b3": bias(ks[9], O),
    }


def reference_forward(inputs, hidden_state, raw, hidden_dim):
    """Unfused pure-JAX reference mirroring the PyTorch module exactly."""
    H = hidden_dim
    x = inputs @ raw["w1"] + raw["b1"]
    h_in = hidden_state.reshape(-1, H)
    gi = x @ raw["w_ih"] + raw["b_ih"]
    gh = h_in @ raw["w_hh"] + raw["b_hh"]
    i_r, i_z, i_n = gi[:, :H], gi[:, H:2 * H], gi[:, 2 * H:]
    h_r, h_z, h_n = gh[:, :H], gh[:, H:2 * H], gh[:, 2 * H:]
    r = jax.nn.sigmoid(i_r + h_r)
    z = jax.nn.sigmoid(i_z + h_z)
    n = jnp.tanh(i_n + r * h_n)
    h = (1.0 - z) * n + z * h_in
    q = h @ raw["w2"] + raw["b2"]
    q = q @ raw["w3"] + raw["b3"]
    return q, h


if __name__ == "__main__":
    B = 8               # batch (e.g. n_agents * batch)
    INPUT_SHAPE = 40    # observation feature size
    HIDDEN = 32         # args.rnn_hidden_dim
    OUTPUT = 16         # output_shape (n_actions)

    key = jax.random.PRNGKey(0)
    k_in, k_h, k_p = jax.random.split(key, 3)

    inputs = jax.random.normal(k_in, (B, INPUT_SHAPE), jnp.float32)
    hidden_state = jax.random.normal(k_h, (B, HIDDEN), jnp.float32)

    raw_params = make_params(k_p, INPUT_SHAPE, HIDDEN, OUTPUT)
    fused_params = pack_params(raw_params, INPUT_SHAPE, HIDDEN, OUTPUT)

    # f32 activation path: tight-parity check against the unfused reference.
    q, h = rnn_agent_forward(inputs, hidden_state, fused_params, HIDDEN, OUTPUT)
    jax.block_until_ready((q, h))

    q_ref, h_ref = reference_forward(inputs, hidden_state, raw_params, HIDDEN)
    assert q.shape == (B, OUTPUT) and h.shape == (B, HIDDEN)
    assert jnp.allclose(q, q_ref, atol=1e-4, rtol=1e-4)
    assert jnp.allclose(h, h_ref, atol=1e-4, rtol=1e-4)

    # bf16 activation I/O (throughput mode): same kernel, f32 math inside,
    # half the HBM traffic for activations in this memory-bound kernel.
    q16, h16 = rnn_agent_forward(inputs.astype(jnp.bfloat16),
                                 hidden_state.astype(jnp.bfloat16),
                                 fused_params, HIDDEN, OUTPUT)
    jax.block_until_ready((q16, h16))
    assert jnp.allclose(q16.astype(jnp.float32), q_ref, atol=3e-2, rtol=3e-2)
    assert jnp.allclose(h16.astype(jnp.float32), h_ref, atol=3e-2, rtol=3e-2)

    print("KERNEL_OK")
</pallas_src>

<mosaic_0001>
module attributes {stable_mosaic.version = 11 : i64} {
  func.func @rnn_agent_kernel(%arg0: i32, %arg1: memref<8x40xf32, #tpu.memory_space<vmem>>, %arg2: memref<8x32xf32, #tpu.memory_space<vmem>>, %arg3: memref<40x128xf32, #tpu.memory_space<vmem>>, %arg4: memref<32x128xf32, #tpu.memory_space<vmem>>, %arg5: memref<1x128xf32, #tpu.memory_space<vmem>>, %arg6: memref<32x128xf32, #tpu.memory_space<vmem>>, %arg7: memref<1x128xf32, #tpu.memory_space<vmem>>, %arg8: memref<8x128xf32, #tpu.memory_space<vmem>>) attributes {dimension_semantics = [#tpu.dimension_semantics<parallel>], iteration_bounds = array<i64: 1>, scalar_prefetch = 0 : i64, scratch_operands = 0 : i64, tpu.core_type = #tpu.core_type<tc>, window_params = [{transform_indices = @transform_0, window_bounds = array<i64: 8, 40>}, {transform_indices = @transform_1, window_bounds = array<i64: 8, 32>}, {pipeline_mode = #tpu.pipeline_mode<synchronous>, transform_indices = @transform_2, window_bounds = array<i64: 40, 128>}, {pipeline_mode = #tpu.pipeline_mode<synchronous>, transform_indices = @transform_3, window_bounds = array<i64: 32, 128>}, {pipeline_mode = #tpu.pipeline_mode<synchronous>, transform_indices = @transform_4, window_bounds = array<i64: 1, 128>}, {pipeline_mode = #tpu.pipeline_mode<synchronous>, transform_indices = @transform_5, window_bounds = array<i64: 32, 128>}, {pipeline_mode = #tpu.pipeline_mode<synchronous>, transform_indices = @transform_6, window_bounds = array<i64: 1, 128>}, {transform_indices = @transform_7, window_bounds = array<i64: 8, 128>}]} {
    %c0 = arith.constant 0 : index
    %c0_0 = arith.constant 0 : index
    %0 = vector.load %arg1[%c0, %c0_0] : memref<8x40xf32, #tpu.memory_space<vmem>>, vector<8x40xf32>
    %c0_1 = arith.constant 0 : index
    %c0_2 = arith.constant 0 : index
    %1 = vector.load %arg2[%c0_1, %c0_2] : memref<8x32xf32, #tpu.memory_space<vmem>>, vector<8x32xf32>
    %c0_3 = arith.constant 0 : index
    %c0_4 = arith.constant 0 : index
    %2 = vector.load %arg3[%c0_3, %c0_4] : memref<40x128xf32, #tpu.memory_space<vmem>>, vector<40x128xf32>
    %cst = arith.constant dense<0.000000e+00> : vector<8x128xf32>
    %3 = tpu.matmul %0, %2, %cst {dimension_numbers = #tpu.dot_dimension_numbers<[1], [0], [0], [1], [0, 0, 1, 1], [], []>} : vector<8x40xf32>, vector<40x128xf32>, vector<8x128xf32> -> vector<8x128xf32>
    %c0_5 = arith.constant 0 : index
    %c0_6 = arith.constant 0 : index
    %4 = vector.load %arg4[%c0_5, %c0_6] : memref<32x128xf32, #tpu.memory_space<vmem>>, vector<32x128xf32>
    %cst_7 = arith.constant dense<0.000000e+00> : vector<8x128xf32>
    %5 = tpu.matmul %1, %4, %cst_7 {dimension_numbers = #tpu.dot_dimension_numbers<[1], [0], [0], [1], [0, 0, 1, 1], [], []>} : vector<8x32xf32>, vector<32x128xf32>, vector<8x128xf32> -> vector<8x128xf32>
    %6 = arith.addf %3, %5 : vector<8x128xf32>
    %c0_8 = arith.constant 0 : index
    %c0_9 = arith.constant 0 : index
    %7 = vector.load %arg5[%c0_8, %c0_9] : memref<1x128xf32, #tpu.memory_space<vmem>>, vector<1x128xf32>
    %8 = vector.broadcast %7 : vector<1x128xf32> to vector<8x128xf32>
    %9 = arith.addf %6, %8 : vector<8x128xf32>
    %10 = vector.extract_strided_slice %9 {offsets = [0, 0], sizes = [8, 64], strides = [1, 1]} : vector<8x128xf32> to vector<8x64xf32>
    %11 = arith.negf %10 : vector<8x64xf32>
    %12 = math.exp %11 : vector<8x64xf32>
    %cst_10 = arith.constant 1.000000e+00 : f32
    %13 = vector.broadcast %cst_10 : f32 to vector<8x64xf32>
    %14 = arith.addf %13, %12 : vector<8x64xf32>
    %15 = arith.divf %13, %14 : vector<8x64xf32>
    %16 = vector.extract_strided_slice %15 {offsets = [0, 0], sizes = [8, 32], strides = [1, 1]} : vector<8x64xf32> to vector<8x32xf32>
    %17 = vector.extract_strided_slice %15 {offsets = [0, 32], sizes = [8, 32], strides = [1, 1]} : vector<8x64xf32> to vector<8x32xf32>
    %18 = vector.extract_strided_slice %9 {offsets = [0, 64], sizes = [8, 32], strides = [1, 1]} : vector<8x128xf32> to vector<8x32xf32>
    %19 = vector.extract_strided_slice %9 {offsets = [0, 96], sizes = [8, 32], strides = [1, 1]} : vector<8x128xf32> to vector<8x32xf32>
    %20 = arith.mulf %16, %19 : vector<8x32xf32>
    %21 = arith.addf %18, %20 : vector<8x32xf32>
    %22 = math.tanh %21 : vector<8x32xf32>
    %cst_11 = arith.constant 1.000000e+00 : f32
    %23 = vector.broadcast %cst_11 : f32 to vector<8x32xf32>
    %24 = arith.subf %23, %17 : vector<8x32xf32>
    %25 = arith.mulf %24, %22 : vector<8x32xf32>
    %26 = arith.mulf %17, %1 : vector<8x32xf32>
    %27 = arith.addf %25, %26 : vector<8x32xf32>
    %c0_12 = arith.constant 0 : index
    %c0_13 = arith.constant 0 : index
    %28 = vector.load %arg6[%c0_12, %c0_13] : memref<32x128xf32, #tpu.memory_space<vmem>>, vector<32x128xf32>
    %cst_14 = arith.constant dense<0.000000e+00> : vector<8x128xf32>
    %29 = tpu.matmul %27, %28, %cst_14 {dimension_numbers = #tpu.dot_dimension_numbers<[1], [0], [0], [1], [0, 0, 1, 1], [], []>} : vector<8x32xf32>, vector<32x128xf32>, vector<8x128xf32> -> vector<8x128xf32>
    %c0_15 = arith.constant 0 : index
    %c0_16 = arith.constant 0 : index
    %30 = vector.load %arg7[%c0_15, %c0_16] : memref<1x128xf32, #tpu.memory_space<vmem>>, vector<1x128xf32>
    %31 = vector.broadcast %30 : vector<1x128xf32> to vector<8x128xf32>
    %32 = arith.addf %29, %31 : vector<8x128xf32>
    %c0_17 = arith.constant 0 : index
    %c0_18 = arith.constant 0 : index
    %33 = vector.load %arg8[%c0_17, %c0_18] : memref<8x128xf32, #tpu.memory_space<vmem>>, vector<8x128xf32>
    tpu.vector_store %arg8[%c0_17, %c0_18], %32 {strides = array<i32>} : memref<8x128xf32, #tpu.memory_space<vmem>>, vector<8x128xf32>,
    %c0_19 = arith.constant 0 : index
    %c0_20 = arith.constant 0 : index
    %34 = vector.load %arg8[%c0_19, %c0_20] : memref<8x128xf32, #tpu.memory_space<vmem>>, vector<8x32xf32>
    tpu.vector_store %arg8[%c0_19, %c0_20], %27 {strides = array<i32>} : memref<8x128xf32, #tpu.memory_space<vmem>>, vector<8x32xf32>,
    return
  }
  func.func @transform_0(%arg0: i32) -> (i32, i32) {
    %c0_i32 = arith.constant 0 : i32
    %c0_i32_0 = arith.constant 0 : i32
    return %arg0, %c0_i32 : i32, i32
  }
  func.func @transform_1(%arg0: i32) -> (i32, i32) {
    %c0_i32 = arith.constant 0 : i32
    %c0_i32_0 = arith.constant 0 : i32
    return %arg0, %c0_i32 : i32, i32
  }
  func.func @transform_2(%arg0: i32) -> (i32, i32) {
    %c0_i32 = arith.constant 0 : i32
    %c0_i32_0 = arith.constant 0 : i32
    %c0_i32_1 = arith.constant 0 : i32
    return %c0_i32, %c0_i32_0 : i32, i32
  }
  func.func @transform_3(%arg0: i32) -> (i32, i32) {
    %c0_i32 = arith.constant 0 : i32
    %c0_i32_0 = arith.constant 0 : i32
    %c0_i32_1 = arith.constant 0 : i32
    return %c0_i32, %c0_i32_0 : i32, i32
  }
  func.func @transform_4(%arg0: i32) -> (i32, i32) {
    %c0_i32 = arith.constant 0 : i32
    %c0_i32_0 = arith.constant 0 : i32
    %c0_i32_1 = arith.constant 0 : i32
    return %c0_i32, %c0_i32_0 : i32, i32
  }
  func.func @transform_5(%arg0: i32) -> (i32, i32) {
    %c0_i32 = arith.constant 0 : i32
    %c0_i32_0 = arith.constant 0 : i32
    %c0_i32_1 = arith.constant 0 : i32
    return %c0_i32, %c0_i32_0 : i32, i32
  }
  func.func @transform_6(%arg0: i32) -> (i32, i32) {
    %c0_i32 = arith.constant 0 : i32
    %c0_i32_0 = arith.constant 0 : i32
    %c0_i32_1 = arith.constant 0 : i32
    return %c0_i32, %c0_i32_0 : i32, i32
  }
  func.func @transform_7(%arg0: i32) -> (i32, i32) {
    %c0_i32 = arith.constant 0 : i32
    %c0_i32_0 = arith.constant 0 : i32
    return %arg0, %c0_i32 : i32, i32
  }
}

</mosaic_0001>

<bundles_post_ra>
// kernel: tpu_custom_call.1
= control target key start
LH: loop header
LB: loop body
LE: loop exit
PB: predicated region body
PF: predicated region fallthrough
CT: control target
= control target key end

     0   :  { %12 = vsyncpa [#allocation3], 0  ;;  %s704_s0 = inlined_call_operand.hbm [shape: f32[8,40], index: 0, kind: input, shape index: {}]   ;;  %s705_s1 = inlined_call_operand.hbm [shape: f32[8,32], index: 1, kind: input, shape index: {}]   ;;  %s706_s2 = inlined_call_operand.hbm [shape: f32[40,128], index: 2, kind: input, shape index: {}]   ;;  %s707_s3 = inlined_call_operand.hbm [shape: f32[32,128], index: 3, kind: input, shape index: {}]   ;;  %s708_s4 = inlined_call_operand.vmem [shape: f32[1,128], index: 4, kind: input, shape index: {}]   ;;  %s709_s5 = inlined_call_operand.hbm [shape: f32[32,128], index: 5, kind: input, shape index: {}]   ;;  %s710_s6 = inlined_call_operand.vmem [shape: f32[1,128], index: 6, kind: input, shape index: {}]   ;;  %s711_s7 = inlined_call_operand.hbm [shape: f32[8,128], index: 7, kind: output, shape index: {}]  }
   0x1   :  { %13 = vsyncpa [#allocation6], 0 }
   0x2   :  { %14 = vsyncpa [#allocation9], 0 }
   0x3   :  { %15 = vsyncpa [#allocation4], 0  ;;  %s596_s24 = smov [#allocation5]  }
   0x4   :  { %s32_s25 = sshll.u32 %s596_s24, 4  ;;  %s33_s25 = int_to_ptr.vmem [resolvable:$true] %s32_s25 }
   0x5   :  { %s476_s26 = scalar_lea.vmem %s33_s25, 128  ;;  %p481_p1 = scmp.lt.s32.totalorder %s33_s25, %s33_s25 }
   0x6   :  { %p477_p0 = scmp.ne.s32.totalorder %s33_s25, %s476_s26  ;;  %p482_p2 = scmp.lt.s32.totalorder %s476_s26, %s476_s26 }
   0x8   :  { %p483_p3 = por %p482_p2, %p481_p1 }
   0xa   :  { %p484_p4 = pnand %p483_p3, %p477_p0 }
   0xc   :  { %487 = shalt.err (!%p484_p4)
}
   0xd   :  { %35 = dma.hbm_to_vmem [thread:$0]  %s705_s1, 128, %s33_s25, [#allocation6]  }
   0xe   :  { %s597_s29 = smov [#allocation8]   ;;  %s598_s8 = smov [#allocation2]  }
   0xf   :  { %s53_s30 = sshll.u32 %s597_s29, 4  ;;  %s22_s9 = sshll.u32 %s598_s8, 4  ;;  %s54_s30 = int_to_ptr.vmem [resolvable:$true] %s53_s30  ;;  %s23_s9 = int_to_ptr.vmem [resolvable:$true] %s22_s9 }
  0x10   :  { %s496_s10 = scalar_lea.vmem %s54_s30, 512  ;;  %p501_p6 = scmp.lt.s32.totalorder %s54_s30, %s54_s30 }
  0x11   :  { %p497_p5 = scmp.ne.s32.totalorder %s54_s30, %s496_s10  ;;  %p502_p7 = scmp.lt.s32.totalorder %s496_s10, %s496_s10 }
  0x13   :  { %p503_p8 = por %p502_p7, %p501_p6 }
  0x15   :  { %p504_p9 = pnand %p503_p8, %p497_p5 }
  0x17   :  { %507 = shalt.err (!%p504_p9)
}
  0x18   :  { %s599_s11 = smov 128   ;;  %s600_s12 = smov 8  }
  0x19   :  { %59 = dma.hbm_to_vmem [thread:$0]  %s707_s3, 512, %s54_s30, [#allocation9], %s599_s11, %s599_s11, %s600_s12  }
  0x1a   :  { %s516_s1 = scalar_lea.vmem %s23_s9, 128  ;;  %p521_p11 = scmp.lt.s32.totalorder %s23_s9, %s23_s9 }
  0x1b   :  { %p517_p10 = scmp.ne.s32.totalorder %s23_s9, %s516_s1  ;;  %p522_p12 = scmp.lt.s32.totalorder %s516_s1, %s516_s1 }
  0x1d   :  { %p523_p13 = por %p522_p12, %p521_p11 }
  0x1f   :  { %p524_p0 = pnand %p523_p13, %p517_p10 }
  0x21   :  { %527 = shalt.err (!%p524_p0)
}
  0x22   :  { %25 = dma.hbm_to_vmem [thread:$0]  %s704_s0, 128, %s23_s9, [#allocation3]  }
  0x23   :  { %s601_s17 = smov [#allocation7]   ;;  %s602_s19 = smov [#allocation10]  }
  0x24   :  { %s41_s18 = sshll.u32 %s601_s17, 4  ;;  %s67_s20 = sshll.u32 %s602_s19, 4  ;;  %s42_s18 = int_to_ptr.vmem [resolvable:$true] %s41_s18  ;;  %s68_s20 = int_to_ptr.vmem [resolvable:$true] %s67_s20 }
  0x25   :  { %s536_s21 = scalar_lea.vmem %s42_s18, 640  ;;  %p541_p2 = scmp.lt.s32.totalorder %s42_s18, %s42_s18 }
  0x26   :  { %p537_p1 = scmp.ne.s32.totalorder %s42_s18, %s536_s21  ;;  %p542_p3 = scmp.lt.s32.totalorder %s536_s21, %s536_s21 }
  0x28   :  { %p543_p4 = por %p542_p3, %p541_p2 }
  0x2a   :  { %p544_p5 = pnand %p543_p4, %p537_p1 }
  0x2c   :  { %547 = shalt.err (!%p544_p5)
}
  0x2d   :  { %47 = dma.hbm_to_vmem [thread:$0]  %s706_s2, 640, %s42_s18, [#allocation6], %s599_s11, %s599_s11, %s600_s12  }
  0x2e   :  { %s556_s0 = scalar_lea.vmem %s68_s20, 512  ;;  %p561_p7 = scmp.lt.s32.totalorder %s68_s20, %s68_s20 }
  0x2f   :  { %p557_p6 = scmp.ne.s32.totalorder %s68_s20, %s556_s0  ;;  %p562_p8 = scmp.lt.s32.totalorder %s556_s0, %s556_s0 }
  0x31   :  { %p563_p9 = por %p562_p8, %p561_p7 }
  0x33   :  { %p564_p10 = pnand %p563_p9, %p557_p6 }
  0x35   :  { %567 = shalt.err (!%p564_p10)
}
  0x36   :  { %73 = dma.hbm_to_vmem [thread:$0]  %s709_s5, 512, %s68_s20, [#allocation9], %s599_s11, %s599_s11, %s600_s12  }
  0x37   :  { %588 = dma.done.wait [#allocation3], 128  }
  0x38   :  { %589 = vsyncadd [#allocation3], 4294967168 }
  0x39   :  { %590 = dma.done.wait [#allocation6], 768  }
  0x3a   :  { %591 = vsyncadd [#allocation6], 4294966528 }
  0x3b   :  { %592 = dma.done.wait [#allocation9], 1024  }
  0x3c   :  { %593 = vsyncadd [#allocation9], 4294966272  ;;  %v603_v0 = vmov 0.0   ;;  %vm604_vm0 = vmmov 0   ;;  %v101_v1 = vld [vmem:[#allocation8 + $0x18] sm:$0xff]  ;;  %v100_v3 = vld [vmem:[#allocation8 + $0x10] sm:$0xff] }
  0x3d   :  { %414 = vmatprep.subr.mxu0 %v603_v0  ;;  %425 = vmatprep.subr.mxu1 %v603_v0  ;;  %v97_v2 = vld [vmem:[#allocation7 + $0x20] sm:$0xff]  ;;  %v96_v4 = vld [vmem:[#allocation7 + $0x18] sm:$0xff]  ;;  %v99_v5 = vld [vmem:[#allocation8 + $0x8] sm:$0xff]  ;;  %vm102_vm1 = vcmask 261120   ;;  %vm176_vm2 = vcmask 326656   ;;  %s605_s25 = smov 32  }
  0x3e   :  { %422 = vmatprep.mubr.msk.f32.mxu0 %vm604_vm0, %v603_v0  ;;  %435 = vmatprep.mubr.msk.f32.mxu1 %vm604_vm0, %v603_v0  ;;  %v95_v6 = vld [vmem:[#allocation7 + $0x10] sm:$0xff]  ;;  %v98_v7 = vld [vmem:[#allocation8] sm:$0xff]  ;;  %v92_v9 = vld [vmem:[#allocation5] sm:$0xff]  ;;  %s606_s26 = smov 64   ;;  %s608_s29 = smov [#allocation11]  }
  0x3f   :  { %415 = vmatpush3.msra.mxu0 %v101_v1  ;;  %426 = vmatpush3.msra.mxu1 %v97_v2  ;;  %v94_v8 = vld [vmem:[#allocation7 + $0x8] sm:$0xff]  ;;  %v93_v10 = vld [vmem:[#allocation7] sm:$0xff]  ;;  %v91_v11 = vld [vmem:[#allocation2] sm:$0xff]  ;;  %s381_s30 = sshll.u32 %s608_s29, 4  ;;  %s382_s30 = int_to_ptr.vmem [resolvable:$true] %s381_s30 }
  0x40   :  { %416 = vmatprep.subr.mxu0 %v603_v0  ;;  %427 = vmatprep.subr.mxu1 %v603_v0  ;;  %v394_v15 = vld [vmem:[%s708_s4] ss:$0 sm:$0xff]  ;;  %v289_v27 = vld [vmem:[#allocation10 + $0x18] sm:$0xff]  ;;  %v288_v28 = vld [vmem:[#allocation10 + $0x10] sm:$0xff]  ;;  %s607_s4 = smov 96   ;;  %s568_s8 = scalar_lea.vmem %s382_s30, 128 }
  0x41   :  { %417 = vmatpush3.msra.mxu0 %v100_v3  ;;  %428 = vmatpush3.msra.mxu1 %v96_v4  ;;  %v287_v29 = vld [vmem:[#allocation10 + $0x8] sm:$0xff]  ;;  %v286_v31 = vld [vmem:[#allocation10] sm:$0xff]  ;;  %p569_p11 = scmp.ne.s32.totalorder %s382_s30, %s568_s8  ;;  %p573_p12 = scmp.lt.s32.totalorder %s382_s30, %s382_s30 }
  0x42   :  { %418 = vmatprep.subr.mxu0 %v603_v0  ;;  %429 = vmatprep.subr.mxu1 %v603_v0  ;;  %v396_v39 = vld [vmem:[%s710_s6] ss:$0 sm:$0xff]  ;;  %p574_p13 = scmp.lt.s32.totalorder %s568_s8, %s568_s8 }
  0x43   :  { %419 = vmatpush3.msra.mxu0 %v99_v5  ;;  %430 = vmatpush3.msra.mxu1 %v95_v6 }
  0x44   :  { %420 = vmatprep.subr.mxu0 %v603_v0  ;;  %431 = vmatprep.subr.mxu1 %v603_v0  ;;  %p575_p0 = por %p574_p13, %p573_p12 }
  0x45   :  { %421 = vmatpush3.msra.mxu0 %v98_v7  ;;  %432 = vmatpush3.msra.mxu1 %v94_v8 }
  0x46   :  { %423 = vmatmul.mubr.msk.f32.vlgmr.msra.gmra.mxu0 %vm102_vm1, %v92_v9  ;;  %433 = vmatprep.subr.mxu1 %v603_v0  ;;  %p576_p1 = pnand %p575_p0, %p569_p11 }
  0x47   :  { %434 = vmatpush3.msra.mxu1 %v93_v10  ;;  %438 = vmatprep.subr.mxu0 %v603_v0 }
  0x48   :  { %436 = vmatmul.mubr.msk.f32.vlgmr.msra.gmra.mxu1 %vm176_vm2, %v91_v11  ;;  %446 = vmatprep.mubr.msk.f32.mxu0 %vm604_vm0, %v603_v0 }
  0x49   :  { %439 = vmatpush3.msra.mxu0 %v289_v27 }
  0x4a   :  { %440 = vmatprep.subr.mxu0 %v603_v0 }
  0x4b   :  { %441 = vmatpush3.msra.mxu0 %v288_v28 }
  0x4c   :  { %442 = vmatprep.subr.mxu0 %v603_v0 }
  0x4d   :  { %443 = vmatpush3.msra.mxu0 %v287_v29 }
  0x4e   :  { %444 = vmatprep.subr.mxu0 %v603_v0 }
  0x4f   :  { %445 = vmatpush3.msra.mxu0 %v286_v31 }
 0x106   :  { %v172_v12 = vpop.f32.mrf.mxu0 }
 0x108   :  { %v424_v13 = vpop.f32.mrf.mxu0  ;;  %v246_v14 = vpop.f32.mrf.mxu1 }
 0x109   :  { %v247_v16 = vadd.f32 %v246_v14, %v172_v12 }
 0x10a   :  { %v437_v17 = vpop.f32.mrf.mxu1 }
 0x10b   :  { %v257_v18 = vadd.f32 %v394_v15, %v247_v16 }
 0x10d   :  { %265 = vrot.lane.b32.xlu0 %v257_v18, %s605_s25  ;;  %v395_v19 = vmul.f32 -1.442695, %v257_v18 }
 0x10f   :  { %462 = vpow2.f32 %v395_v19 }
 0x11c   :  { %v463_v20 = vpop.eup %462 }
 0x11d   :  { %v261_v21 = vadd.f32 1.0, %v463_v20 }
 0x11f   :  { %464 = vrcp.f32 %v261_v21 }
 0x12c   :  { %v465_v22 = vpop.eup %464 }
 0x12d   :  { %v275_v33 = vsub.f32 1.0, %v465_v22 }
 0x17f   :  { %v266_v23 = vpop.permute.xlu0 %265 }
 0x180   :  { %v268_v24 = vmul.f32 %v465_v22, %v266_v23 }
 0x182   :  { %270 = vrot.lane.b32.xlu0 %v268_v24, %s606_s26 }
 0x1f4   :  { %v271_v25 = vpop.permute.xlu0 %270 }
 0x1f5   :  { %v273_v26 = vadd.f32 %v271_v25, %v257_v18 }
 0x1f7   :  { %466 = vtanh.f32 %v273_v26 }
 0x204   :  { %v467_v30 = vpop.eup %466 }
 0x205   :  { %277 = vrot.lane.b32.xlu1 %v467_v30, %s607_s4 }
 0x209   :  { %281 = vrot.lane.b32.xlu1 %v92_v9, %s605_s25 }
 0x277   :  { %v278_v32 = vpop.permute.xlu1 %277 }
 0x278   :  { %v280_v35 = vmul.f32 %v278_v32, %v275_v33 }
 0x27b   :  { %v282_v34 = vpop.permute.xlu1 %281 }
 0x27c   :  { %v284_v36 = vmul.f32 %v465_v22, %v282_v34 }
 0x27e   :  { %v285_v37 = vadd.f32 %v284_v36, %v280_v35 }
 0x280   :  { %298 = vrot.lane.b32.xlu0 %v285_v37, %s607_s4 }
 0x2f2   :  { %v299_v38 = vpop.permute.xlu0 %298 }
 0x2f3   :  { %447 = vmatmul.mubr.msk.f32.vlgmr.msra.gmra.mxu0 %vm102_vm1, %v299_v38 }
 0x3b3   :  { %v368_v40 = vpop.f32.mrf.mxu0 }
 0x3b4   :  { %v369_v41 = vadd.f32 %v396_v39, %v368_v40 }
 0x3b5   :  { %v448_v42 = vpop.f32.mrf.mxu0 }
 0x3b6   :  { %372 = vst [vmem:[#allocation11] sm:$0xff] %v369_v41 }
 0x3b7   :  { %374 = vst.msk [vmem:[#allocation11] sm:$0xff] %vm102_vm1, %v299_v38 }
 0x3b8   :  { %579 = shalt.err (!%p576_p1)
}
 0x3b9   :  { %384 = dma.vmem_to_hbm [thread:$0]  %s382_s30, 128, %s711_s7, [#allocation4]  }
 0x3ba   :  { %594 = dma.done.wait [#allocation4], 128  }
 0x3bb   :  { %595 = vsyncadd [#allocation4], 4294967168 }
 0x3bc   :  { %388 = vsyncpa [#allocation3], 1 }
 0x3bd   :  { %389 = vsyncpa [#allocation6], 1 }
 0x3be   :  { %390 = vsyncpa [#allocation9], 1 }
 0x3bf   :  { %391 = vsyncpa [#allocation4], 1 }

</bundles_post_ra>
